<compile_context>
chip_gen: v5e
topology: v5e:2x2
jax: 0.10.0
libtpu: 0.0.40
codegen_flags: <defaults>
</compile_context>

<pallas_src>
import functools

import numpy as np
import jax
import jax.numpy as jnp
from jax.experimental import pallas as pl
from jax.experimental.pallas import tpu as pltpu


# ---------------------------------------------------------------------------
# Kernel 1: batched embedding row gather (scalar-prefetch ids + manual DMA).
# ---------------------------------------------------------------------------
def _embedding_gather_kernel(ids_ref, table_ref, out_ref, rows_vmem, sems, *, rows):
    """Gather `rows` embedding rows per grid step.

    ids_ref   : (BT_pad,) int32 in SMEM (scalar prefetch)
    table_ref : (V, Emb) ref left in HBM (memory_space=pl.ANY)
    out_ref   : (rows, Emb) VMEM output block
    rows_vmem : (rows, Emb) VMEM scratch
    sems      : (rows,) DMA semaphores
    """
    base = pl.program_id(0) * rows
    copies = []
    for r in range(rows):                      # unrolled: `rows` DMAs in flight
        tok = ids_ref[base + r]
        cp = pltpu.make_async_copy(table_ref.at[tok], rows_vmem.at[r], sems.at[r])
        cp.start()
        copies.append(cp)
    for cp in copies:
        cp.wait()
    out_ref[...] = rows_vmem[...]              # one sublane-dense (rows, Emb) store


def pallas_embedding(ids_flat, table, rows_per_step=8):
    """ids_flat: (BT,) int32 token ids, table: (V, Emb) -> (BT, Emb)."""
    BT = ids_flat.shape[0]
    _, Emb = table.shape
    bt_pad = ((BT + rows_per_step - 1) // rows_per_step) * rows_per_step
    if bt_pad != BT:
        ids_flat = jnp.pad(ids_flat, (0, bt_pad - BT))     # pad with token 0
    n_steps = bt_pad // rows_per_step

    out = pl.pallas_call(
        functools.partial(_embedding_gather_kernel, rows=rows_per_step),
        out_shape=jax.ShapeDtypeStruct((bt_pad, Emb), table.dtype),
        grid_spec=pltpu.PrefetchScalarGridSpec(
            num_scalar_prefetch=1,             # ids -> SMEM, visible to index_maps
            grid=(n_steps,),
            in_specs=[pl.BlockSpec(memory_space=pl.ANY)],   # table stays in HBM
            out_specs=pl.BlockSpec((rows_per_step, Emb), lambda i, ids: (i, 0)),
            scratch_shapes=[
                pltpu.VMEM((rows_per_step, Emb), table.dtype),
                pltpu.SemaphoreType.DMA((rows_per_step,)),
            ],
        ),
        compiler_params=pltpu.CompilerParams(
            dimension_semantics=("parallel",),
        ),
    )(ids_flat, table)
    return out[:BT]


# ---------------------------------------------------------------------------
# Kernel 2: tiled pixel-mean reduction over P (VMEM-budgeted tiles, f32 acc).
# ---------------------------------------------------------------------------
def _pixel_mean_kernel(enc_ref, mean_ref, acc_ref, *, inv_num_pixels):
    pi = pl.program_id(1)

    @pl.when(pi == 0)
    def _():
        acc_ref[...] = jnp.zeros_like(acc_ref)

    acc_ref[...] += jnp.sum(enc_ref[...].astype(jnp.float32), axis=1)

    @pl.when(pi == pl.num_programs(1) - 1)
    def _():
        mean_ref[...] = acc_ref[...] * inv_num_pixels


def _round_up(x, m):
    return ((x + m - 1) // m) * m


def _target_block_bytes():
    # ~2 MiB enc blocks already sit near the HBM roofline; allow 4 MiB only on
    # parts with >= 96 MiB VMEM per core, so v7x (64 MiB) keeps the small tile.
    try:
        vmem_cap = pltpu.get_tpu_info().vmem_capacity_bytes
    except Exception:
        vmem_cap = 64 * 1024 * 1024
    return (4 << 20) if vmem_cap >= (96 << 20) else (2 << 20)


def _pick_b_tile(B):
    # Two B-blocks (when B allows an 8-aligned split) so v7x's 2 TensorCores
    # can each stream half the batch; harmless on 1-TC parts.
    if B % 2 == 0 and (B // 2) % 8 == 0:
        return B // 2
    return B


def _pick_p_tile(P, b_tile, E, itemsize, target_block_bytes):
    sublane = 16 if itemsize == 2 else 8       # bf16 packs 2 rows per sublane
    rows = target_block_bytes // max(1, b_tile * E * itemsize)
    rows = max(sublane, (rows // sublane) * sublane)
    return min(rows, _round_up(P, sublane))


def pallas_pixel_mean(enc, num_pixels_real, target_block_bytes=None):
    """enc: (B, P, E) -> mean over P as (B, E) float32."""
    B, P, E = enc.shape
    itemsize = jnp.dtype(enc.dtype).itemsize
    if target_block_bytes is None:
        target_block_bytes = _target_block_bytes()
    b_tile = _pick_b_tile(B)
    p_tile = _pick_p_tile(P, b_tile, E, itemsize, target_block_bytes)
    P_pad = _round_up(P, p_tile)
    if P_pad != P:
        # zero rows contribute 0 to the sum; 1/num_pixels_real keeps mean exact
        enc = jnp.pad(enc, ((0, 0), (0, P_pad - P), (0, 0)))
    n_b = B // b_tile
    n_p = P_pad // p_tile

    # Explicit VMEM budget: 2 enc buffers + out double-buffer + accumulator.
    block_bytes = b_tile * p_tile * E * itemsize
    vmem_needed = 2 * block_bytes + 3 * (b_tile * E * 4) + (4 << 20)
    vmem_limit = int(max(vmem_needed, 16 << 20))

    kernel = functools.partial(
        _pixel_mean_kernel, inv_num_pixels=1.0 / float(num_pixels_real))
    return pl.pallas_call(
        kernel,
        out_shape=jax.ShapeDtypeStruct((B, E), jnp.float32),
        grid_spec=pltpu.PrefetchScalarGridSpec(
            num_scalar_prefetch=0,
            grid=(n_b, n_p),
            in_specs=[pl.BlockSpec((b_tile, p_tile, E), lambda b, p: (b, p, 0))],
            out_specs=pl.BlockSpec((b_tile, E), lambda b, p: (b, 0)),
            scratch_shapes=[pltpu.VMEM((b_tile, E), jnp.float32)],
        ),
        compiler_params=pltpu.CompilerParams(
            dimension_semantics=("parallel", "arbitrary"),
            vmem_limit_bytes=vmem_limit,
        ),
    )(enc)


# ---------------------------------------------------------------------------
# Device-side forward (one jit: sort + both Pallas calls + small XLA glue)
# ---------------------------------------------------------------------------
@jax.jit
def _device_forward(params, encoder_out, encoded_captions, caption_lengths):
    B = encoder_out.shape[0]
    E = encoder_out.shape[-1]
    V, Emb = params["embedding"].shape
    D = params["init_h_w"].shape[1]

    enc = encoder_out.reshape(B, -1, E)                    # (B, P, E)
    P = enc.shape[1]

    # sort by decreasing caption length (torch .sort(descending=True));
    # NOTE: tie order may differ from torch's (unstable) sort.
    cl = jnp.squeeze(caption_lengths, axis=1)
    sort_ind = jnp.argsort(-cl)
    cl_sorted = cl[sort_ind]
    caps_sorted = encoded_captions[sort_ind]

    # embedding lookup: Pallas batched DMA row gather (8 rows / grid step)
    T = caps_sorted.shape[1]
    ids_flat = caps_sorted.reshape(B * T).astype(jnp.int32)
    embeddings = pallas_embedding(ids_flat, params["embedding"]).reshape(B, T, Emb)

    # Pixel mean over the UNSORTED enc (mean + Linear are row-wise, so we can
    # permute the small (B, D) results instead of the (B, P, E) tensor).
    # The HBM-bound enc stream goes through bf16; accumulation stays f32.
    # (In a full pipeline the encoder would emit bf16 directly.)
    mean_enc = pallas_pixel_mean(enc.astype(jnp.bfloat16), num_pixels_real=P)

    # The tiny fused (B,E)x(E,2D) init_h|init_c matmul stays in XLA: negligible
    # FLOPs, keeps the weight out of the kernel's VMEM budget, and avoids the
    # lane-misaligned hc split inside the kernel.
    w_hc = jnp.concatenate([params["init_h_w"], params["init_c_w"]], axis=1)
    b_hc = jnp.concatenate([params["init_h_b"], params["init_c_b"]], axis=1)
    hc = mean_enc @ w_hc + b_hc                            # (B, 2D) f32
    h = hc[:, :D][sort_ind]
    c = hc[:, D:][sort_ind]

    # predictions / alphas allocated inside the jit (a future decode loop
    # would write into these, fused); sliced to max(decode_lengths) after the
    # host sync in decoder_forward.
    preds_full = jnp.zeros((B, T - 1, V), jnp.float32)
    alphas_full = jnp.zeros((B, T - 1, P), jnp.float32)

    return sort_ind, cl_sorted, caps_sorted, embeddings, h, c, preds_full, alphas_full


# ---------------------------------------------------------------------------
# Decoder forward (mirrors DecoderWithAttention.forward)
# ---------------------------------------------------------------------------
def decoder_forward(params, encoder_out, encoded_captions, caption_lengths):
    (sort_ind, cl_sorted, caps_sorted, embeddings, h, c,
     preds_full, alphas_full) = _device_forward(
        params, encoder_out, encoded_captions, caption_lengths)

    # decode_lengths = (caption_lengths - 1).tolist() -- host glue AFTER all
    # device work has been dispatched, so the sync does not stall launches.
    # TODO(synk): .tolist() is inherently a device->host sync with no Pallas equivalent.
    decode_lengths = [int(x) - 1 for x in np.asarray(cl_sorted)]
    max_dec = max(decode_lengths)

    # TODO(synk): the reference forward() returns all-zero predictions/alphas;
    # the attention + LSTMCell + fc decode loop lives in one_step, not forward.
    predictions = preds_full[:, :max_dec]
    alphas = alphas_full[:, :max_dec]

    return (predictions, caps_sorted, decode_lengths, alphas, sort_ind), (
        embeddings, h, c)


# ---------------------------------------------------------------------------
# Deterministic parameter construction (shapes from __init__)
# ---------------------------------------------------------------------------
def make_params(key, vocab_size, embed_dim, encoder_dim, decoder_dim):
    k_emb, k_hw, k_hb, k_cw, k_cb, k_fcw = jax.random.split(key, 6)
    params = {
        # nn.Embedding(vocab_size, embed_dim), uniform_(-0.1, 0.1)
        "embedding": jax.random.uniform(
            k_emb, (vocab_size, embed_dim), jnp.float32, -0.1, 0.1),
        # nn.Linear(encoder_dim, decoder_dim) stored pre-transposed (E, D)
        "init_h_w": jax.random.uniform(
            k_hw, (encoder_dim, decoder_dim), jnp.float32, -0.1, 0.1),
        "init_h_b": jax.random.uniform(
            k_hb, (1, decoder_dim), jnp.float32, -0.1, 0.1),
        "init_c_w": jax.random.uniform(
            k_cw, (encoder_dim, decoder_dim), jnp.float32, -0.1, 0.1),
        "init_c_b": jax.random.uniform(
            k_cb, (1, decoder_dim), jnp.float32, -0.1, 0.1),
        # fc = nn.Linear(decoder_dim, vocab_size): initialized but unused in
        # forward() (only used in one_step).
        "fc_w": jax.random.uniform(
            k_fcw, (decoder_dim, vocab_size), jnp.float32, -0.1, 0.1),
        "fc_b": jnp.zeros((1, vocab_size), jnp.float32),
    }
    return params


if __name__ == "__main__":
    # small config consistent with the module
    B = 2
    enc_image_size = 4            # -> num_pixels = 16
    encoder_dim = 128
    decoder_dim = 128
    embed_dim = 128
    vocab_size = 256
    max_cap_len = 8

    key = jax.random.PRNGKey(0)
    k_p, k_enc, k_cap, k_len = jax.random.split(key, 4)

    params = make_params(k_p, vocab_size, embed_dim, encoder_dim, decoder_dim)

    encoder_out = jax.random.normal(
        k_enc, (B, enc_image_size, enc_image_size, encoder_dim), jnp.float32)
    encoded_captions = jax.random.randint(
        k_cap, (B, max_cap_len), 0, vocab_size, jnp.int32)
    caption_lengths = jax.random.randint(
        k_len, (B, 1), 2, max_cap_len + 1, jnp.int32)

    (preds, caps_sorted, dec_lens, alphas, sort_ind), (emb, h, c) = decoder_forward(
        params, encoder_out, encoded_captions, caption_lengths)
    jax.block_until_ready((preds, caps_sorted, alphas, sort_ind, emb, h, c))

    # sanity-check Pallas results against a pure-JAX reference
    enc_flat = encoder_out.reshape(B, -1, encoder_dim)[sort_ind]
    mean_ref = jnp.mean(enc_flat, axis=1)
    h_ref = mean_ref @ params["init_h_w"] + params["init_h_b"]
    c_ref = mean_ref @ params["init_c_w"] + params["init_c_b"]
    emb_ref = params["embedding"][encoded_captions[sort_ind]]
    # enc stream goes through bf16, so allow a small tolerance on h/c
    assert np.allclose(np.asarray(h), np.asarray(h_ref), atol=2e-2)
    assert np.allclose(np.asarray(c), np.asarray(c_ref), atol=2e-2)
    assert np.allclose(np.asarray(emb), np.asarray(emb_ref), atol=1e-6)
    assert preds.shape == (B, max(dec_lens), vocab_size) and not np.any(np.asarray(preds))
    assert alphas.shape == (B, max(dec_lens), enc_image_size * enc_image_size)

    # extra check: awkward P (25, not tile-aligned) with a tiny block budget
    # forces multi-step reduction + padding path.
    enc_odd = jax.random.normal(jax.random.PRNGKey(1), (2, 25, 128), jnp.float32)
    mean_odd = pallas_pixel_mean(enc_odd.astype(jnp.bfloat16), num_pixels_real=25,
                                 target_block_bytes=4096)
    assert np.allclose(np.asarray(mean_odd),
                       np.asarray(jnp.mean(enc_odd, axis=1)), atol=2e-2)

    # extra check: gather with BT not divisible by rows_per_step (pad path)
    ids_odd = (jnp.arange(13, dtype=jnp.int32) * 7) % vocab_size
    emb_odd = pallas_embedding(ids_odd, params["embedding"])
    assert np.allclose(np.asarray(emb_odd),
                       np.asarray(params["embedding"][ids_odd]), atol=1e-6)

    print("KERNEL_OK")
</pallas_src>

<mosaic_0001>
module attributes {stable_mosaic.version = 11 : i64} {
  func.func @_embedding_gather_kernel(%arg0: i32, %arg1: memref<16xi32, #tpu.memory_space<smem>>, %arg2: memref<256x128xf32, #tpu.memory_space<any>>, %arg3: memref<8x128xf32, #tpu.memory_space<vmem>>, %arg4: memref<8x128xf32, #tpu.memory_space<vmem>>, %arg5: memref<8x!tpu.dma_semaphore, #tpu.memory_space<semaphore_mem>>) attributes {dimension_semantics = [#tpu.dimension_semantics<parallel>], iteration_bounds = array<i64: 2>, scalar_prefetch = 1 : i64, scratch_operands = 2 : i64, tpu.core_type = #tpu.core_type<tc>, window_params = [{}, {transform_indices = @transform_1, window_bounds = array<i64: 8, 128>}]} {
    %c8_i32 = arith.constant 8 : i32
    %0 = arith.muli %arg0, %c8_i32 : i32
    %c0_i32 = arith.constant 0 : i32
    %1 = arith.addi %0, %c0_i32 : i32
    %2 = arith.index_cast %1 : i32 to index
    %3 = memref.load %arg1[%2] : memref<16xi32, #tpu.memory_space<smem>>
    %c0_i32_0 = arith.constant 0 : i32
    %c0_i32_1 = arith.constant 0 : i32
    %c0_i32_2 = arith.constant 0 : i32
    %4 = tpu.memref_slice %arg2[%3, %c0_i32_2] : memref<256x128xf32, #tpu.memory_space<any>> -> memref<1x128xf32, #tpu.memory_space<any>>
    %5 = tpu.memref_squeeze %4 : memref<1x128xf32, #tpu.memory_space<any>> -> memref<128xf32, #tpu.memory_space<any>>
    %c0_i32_3 = arith.constant 0 : i32
    %6 = tpu.memref_slice %arg4[%c0_i32_0, %c0_i32_3] : memref<8x128xf32, #tpu.memory_space<vmem>> -> memref<1x128xf32, #tpu.memory_space<vmem>>
    %7 = tpu.memref_squeeze %6 : memref<1x128xf32, #tpu.memory_space<vmem>> -> memref<128xf32, #tpu.memory_space<vmem>>
    %8 = tpu.memref_slice %arg5[%c0_i32_1] : memref<8x!tpu.dma_semaphore, #tpu.memory_space<semaphore_mem>> -> memref<1x!tpu.dma_semaphore, #tpu.memory_space<semaphore_mem>>
    %9 = tpu.memref_squeeze %8 : memref<1x!tpu.dma_semaphore, #tpu.memory_space<semaphore_mem>> -> memref<!tpu.dma_semaphore, #tpu.memory_space<semaphore_mem>>
    tpu.enqueue_dma source(%5 : memref<128xf32, #tpu.memory_space<any>>) target(%7 : memref<128xf32, #tpu.memory_space<vmem>>) target_semaphore(%9 : memref<!tpu.dma_semaphore, #tpu.memory_space<semaphore_mem>>)
    %c1_i32 = arith.constant 1 : i32
    %10 = arith.addi %0, %c1_i32 : i32
    %11 = arith.index_cast %10 : i32 to index
    %12 = memref.load %arg1[%11] : memref<16xi32, #tpu.memory_space<smem>>
    %c1_i32_4 = arith.constant 1 : i32
    %c1_i32_5 = arith.constant 1 : i32
    %c0_i32_6 = arith.constant 0 : i32
    %13 = tpu.memref_slice %arg2[%12, %c0_i32_6] : memref<256x128xf32, #tpu.memory_space<any>> -> memref<1x128xf32, #tpu.memory_space<any>>
    %14 = tpu.memref_squeeze %13 : memref<1x128xf32, #tpu.memory_space<any>> -> memref<128xf32, #tpu.memory_space<any>>
    %c0_i32_7 = arith.constant 0 : i32
    %15 = tpu.memref_slice %arg4[%c1_i32_4, %c0_i32_7] : memref<8x128xf32, #tpu.memory_space<vmem>> -> memref<1x128xf32, #tpu.memory_space<vmem>>
    %16 = tpu.memref_squeeze %15 : memref<1x128xf32, #tpu.memory_space<vmem>> -> memref<128xf32, #tpu.memory_space<vmem>>
    %17 = tpu.memref_slice %arg5[%c1_i32_5] : memref<8x!tpu.dma_semaphore, #tpu.memory_space<semaphore_mem>> -> memref<1x!tpu.dma_semaphore, #tpu.memory_space<semaphore_mem>>
    %18 = tpu.memref_squeeze %17 : memref<1x!tpu.dma_semaphore, #tpu.memory_space<semaphore_mem>> -> memref<!tpu.dma_semaphore, #tpu.memory_space<semaphore_mem>>
    tpu.enqueue_dma source(%14 : memref<128xf32, #tpu.memory_space<any>>) target(%16 : memref<128xf32, #tpu.memory_space<vmem>>) target_semaphore(%18 : memref<!tpu.dma_semaphore, #tpu.memory_space<semaphore_mem>>)
    %c2_i32 = arith.constant 2 : i32
    %19 = arith.addi %0, %c2_i32 : i32
    %20 = arith.index_cast %19 : i32 to index
    %21 = memref.load %arg1[%20] : memref<16xi32, #tpu.memory_space<smem>>
    %c2_i32_8 = arith.constant 2 : i32
    %c2_i32_9 = arith.constant 2 : i32
    %c0_i32_10 = arith.constant 0 : i32
    %22 = tpu.memref_slice %arg2[%21, %c0_i32_10] : memref<256x128xf32, #tpu.memory_space<any>> -> memref<1x128xf32, #tpu.memory_space<any>>
    %23 = tpu.memref_squeeze %22 : memref<1x128xf32, #tpu.memory_space<any>> -> memref<128xf32, #tpu.memory_space<any>>
    %c0_i32_11 = arith.constant 0 : i32
    %24 = tpu.memref_slice %arg4[%c2_i32_8, %c0_i32_11] : memref<8x128xf32, #tpu.memory_space<vmem>> -> memref<1x128xf32, #tpu.memory_space<vmem>>
    %25 = tpu.memref_squeeze %24 : memref<1x128xf32, #tpu.memory_space<vmem>> -> memref<128xf32, #tpu.memory_space<vmem>>
    %26 = tpu.memref_slice %arg5[%c2_i32_9] : memref<8x!tpu.dma_semaphore, #tpu.memory_space<semaphore_mem>> -> memref<1x!tpu.dma_semaphore, #tpu.memory_space<semaphore_mem>>
    %27 = tpu.memref_squeeze %26 : memref<1x!tpu.dma_semaphore, #tpu.memory_space<semaphore_mem>> -> memref<!tpu.dma_semaphore, #tpu.memory_space<semaphore_mem>>
    tpu.enqueue_dma source(%23 : memref<128xf32, #tpu.memory_space<any>>) target(%25 : memref<128xf32, #tpu.memory_space<vmem>>) target_semaphore(%27 : memref<!tpu.dma_semaphore, #tpu.memory_space<semaphore_mem>>)
    %c3_i32 = arith.constant 3 : i32
    %28 = arith.addi %0, %c3_i32 : i32
    %29 = arith.index_cast %28 : i32 to index
    %30 = memref.load %arg1[%29] : memref<16xi32, #tpu.memory_space<smem>>
    %c3_i32_12 = arith.constant 3 : i32
    %c3_i32_13 = arith.constant 3 : i32
    %c0_i32_14 = arith.constant 0 : i32
    %31 = tpu.memref_slice %arg2[%30, %c0_i32_14] : memref<256x128xf32, #tpu.memory_space<any>> -> memref<1x128xf32, #tpu.memory_space<any>>
    %32 = tpu.memref_squeeze %31 : memref<1x128xf32, #tpu.memory_space<any>> -> memref<128xf32, #tpu.memory_space<any>>
    %c0_i32_15 = arith.constant 0 : i32
    %33 = tpu.memref_slice %arg4[%c3_i32_12, %c0_i32_15] : memref<8x128xf32, #tpu.memory_space<vmem>> -> memref<1x128xf32, #tpu.memory_space<vmem>>
    %34 = tpu.memref_squeeze %33 : memref<1x128xf32, #tpu.memory_space<vmem>> -> memref<128xf32, #tpu.memory_space<vmem>>
    %35 = tpu.memref_slice %arg5[%c3_i32_13] : memref<8x!tpu.dma_semaphore, #tpu.memory_space<semaphore_mem>> -> memref<1x!tpu.dma_semaphore, #tpu.memory_space<semaphore_mem>>
    %36 = tpu.memref_squeeze %35 : memref<1x!tpu.dma_semaphore, #tpu.memory_space<semaphore_mem>> -> memref<!tpu.dma_semaphore, #tpu.memory_space<semaphore_mem>>
    tpu.enqueue_dma source(%32 : memref<128xf32, #tpu.memory_space<any>>) target(%34 : memref<128xf32, #tpu.memory_space<vmem>>) target_semaphore(%36 : memref<!tpu.dma_semaphore, #tpu.memory_space<semaphore_mem>>)
    %c4_i32 = arith.constant 4 : i32
    %37 = arith.addi %0, %c4_i32 : i32
    %38 = arith.index_cast %37 : i32 to index
    %39 = memref.load %arg1[%38] : memref<16xi32, #tpu.memory_space<smem>>
    %c4_i32_16 = arith.constant 4 : i32
    %c4_i32_17 = arith.constant 4 : i32
    %c0_i32_18 = arith.constant 0 : i32
    %40 = tpu.memref_slice %arg2[%39, %c0_i32_18] : memref<256x128xf32, #tpu.memory_space<any>> -> memref<1x128xf32, #tpu.memory_space<any>>
    %41 = tpu.memref_squeeze %40 : memref<1x128xf32, #tpu.memory_space<any>> -> memref<128xf32, #tpu.memory_space<any>>
    %c0_i32_19 = arith.constant 0 : i32
    %42 = tpu.memref_slice %arg4[%c4_i32_16, %c0_i32_19] : memref<8x128xf32, #tpu.memory_space<vmem>> -> memref<1x128xf32, #tpu.memory_space<vmem>>
    %43 = tpu.memref_squeeze %42 : memref<1x128xf32, #tpu.memory_space<vmem>> -> memref<128xf32, #tpu.memory_space<vmem>>
    %44 = tpu.memref_slice %arg5[%c4_i32_17] : memref<8x!tpu.dma_semaphore, #tpu.memory_space<semaphore_mem>> -> memref<1x!tpu.dma_semaphore, #tpu.memory_space<semaphore_mem>>
    %45 = tpu.memref_squeeze %44 : memref<1x!tpu.dma_semaphore, #tpu.memory_space<semaphore_mem>> -> memref<!tpu.dma_semaphore, #tpu.memory_space<semaphore_mem>>
    tpu.enqueue_dma source(%41 : memref<128xf32, #tpu.memory_space<any>>) target(%43 : memref<128xf32, #tpu.memory_space<vmem>>) target_semaphore(%45 : memref<!tpu.dma_semaphore, #tpu.memory_space<semaphore_mem>>)
    %c5_i32 = arith.constant 5 : i32
    %46 = arith.addi %0, %c5_i32 : i32
    %47 = arith.index_cast %46 : i32 to index
    %48 = memref.load %arg1[%47] : memref<16xi32, #tpu.memory_space<smem>>
    %c5_i32_20 = arith.constant 5 : i32
    %c5_i32_21 = arith.constant 5 : i32
    %c0_i32_22 = arith.constant 0 : i32
    %49 = tpu.memref_slice %arg2[%48, %c0_i32_22] : memref<256x128xf32, #tpu.memory_space<any>> -> memref<1x128xf32, #tpu.memory_space<any>>
    %50 = tpu.memref_squeeze %49 : memref<1x128xf32, #tpu.memory_space<any>> -> memref<128xf32, #tpu.memory_space<any>>
    %c0_i32_23 = arith.constant 0 : i32
    %51 = tpu.memref_slice %arg4[%c5_i32_20, %c0_i32_23] : memref<8x128xf32, #tpu.memory_space<vmem>> -> memref<1x128xf32, #tpu.memory_space<vmem>>
    %52 = tpu.memref_squeeze %51 : memref<1x128xf32, #tpu.memory_space<vmem>> -> memref<128xf32, #tpu.memory_space<vmem>>
    %53 = tpu.memref_slice %arg5[%c5_i32_21] : memref<8x!tpu.dma_semaphore, #tpu.memory_space<semaphore_mem>> -> memref<1x!tpu.dma_semaphore, #tpu.memory_space<semaphore_mem>>
    %54 = tpu.memref_squeeze %53 : memref<1x!tpu.dma_semaphore, #tpu.memory_space<semaphore_mem>> -> memref<!tpu.dma_semaphore, #tpu.memory_space<semaphore_mem>>
    tpu.enqueue_dma source(%50 : memref<128xf32, #tpu.memory_space<any>>) target(%52 : memref<128xf32, #tpu.memory_space<vmem>>) target_semaphore(%54 : memref<!tpu.dma_semaphore, #tpu.memory_space<semaphore_mem>>)
    %c6_i32 = arith.constant 6 : i32
    %55 = arith.addi %0, %c6_i32 : i32
    %56 = arith.index_cast %55 : i32 to index
    %57 = memref.load %arg1[%56] : memref<16xi32, #tpu.memory_space<smem>>
    %c6_i32_24 = arith.constant 6 : i32
    %c6_i32_25 = arith.constant 6 : i32
    %c0_i32_26 = arith.constant 0 : i32
    %58 = tpu.memref_slice %arg2[%57, %c0_i32_26] : memref<256x128xf32, #tpu.memory_space<any>> -> memref<1x128xf32, #tpu.memory_space<any>>
    %59 = tpu.memref_squeeze %58 : memref<1x128xf32, #tpu.memory_space<any>> -> memref<128xf32, #tpu.memory_space<any>>
    %c0_i32_27 = arith.constant 0 : i32
    %60 = tpu.memref_slice %arg4[%c6_i32_24, %c0_i32_27] : memref<8x128xf32, #tpu.memory_space<vmem>> -> memref<1x128xf32, #tpu.memory_space<vmem>>
    %61 = tpu.memref_squeeze %60 : memref<1x128xf32, #tpu.memory_space<vmem>> -> memref<128xf32, #tpu.memory_space<vmem>>
    %62 = tpu.memref_slice %arg5[%c6_i32_25] : memref<8x!tpu.dma_semaphore, #tpu.memory_space<semaphore_mem>> -> memref<1x!tpu.dma_semaphore, #tpu.memory_space<semaphore_mem>>
    %63 = tpu.memref_squeeze %62 : memref<1x!tpu.dma_semaphore, #tpu.memory_space<semaphore_mem>> -> memref<!tpu.dma_semaphore, #tpu.memory_space<semaphore_mem>>
    tpu.enqueue_dma source(%59 : memref<128xf32, #tpu.memory_space<any>>) target(%61 : memref<128xf32, #tpu.memory_space<vmem>>) target_semaphore(%63 : memref<!tpu.dma_semaphore, #tpu.memory_space<semaphore_mem>>)
    %c7_i32 = arith.constant 7 : i32
    %64 = arith.addi %0, %c7_i32 : i32
    %65 = arith.index_cast %64 : i32 to index
    %66 = memref.load %arg1[%65] : memref<16xi32, #tpu.memory_space<smem>>
    %c7_i32_28 = arith.constant 7 : i32
    %c7_i32_29 = arith.constant 7 : i32
    %c0_i32_30 = arith.constant 0 : i32
    %67 = tpu.memref_slice %arg2[%66, %c0_i32_30] : memref<256x128xf32, #tpu.memory_space<any>> -> memref<1x128xf32, #tpu.memory_space<any>>
    %68 = tpu.memref_squeeze %67 : memref<1x128xf32, #tpu.memory_space<any>> -> memref<128xf32, #tpu.memory_space<any>>
    %c0_i32_31 = arith.constant 0 : i32
    %69 = tpu.memref_slice %arg4[%c7_i32_28, %c0_i32_31] : memref<8x128xf32, #tpu.memory_space<vmem>> -> memref<1x128xf32, #tpu.memory_space<vmem>>
    %70 = tpu.memref_squeeze %69 : memref<1x128xf32, #tpu.memory_space<vmem>> -> memref<128xf32, #tpu.memory_space<vmem>>
    %71 = tpu.memref_slice %arg5[%c7_i32_29] : memref<8x!tpu.dma_semaphore, #tpu.memory_space<semaphore_mem>> -> memref<1x!tpu.dma_semaphore, #tpu.memory_space<semaphore_mem>>
    %72 = tpu.memref_squeeze %71 : memref<1x!tpu.dma_semaphore, #tpu.memory_space<semaphore_mem>> -> memref<!tpu.dma_semaphore, #tpu.memory_space<semaphore_mem>>
    tpu.enqueue_dma source(%68 : memref<128xf32, #tpu.memory_space<any>>) target(%70 : memref<128xf32, #tpu.memory_space<vmem>>) target_semaphore(%72 : memref<!tpu.dma_semaphore, #tpu.memory_space<semaphore_mem>>)
    %c0_i32_32 = arith.constant 0 : i32
    %c0_i32_33 = arith.constant 0 : i32
    %c0_i32_34 = arith.constant 0 : i32
    %73 = tpu.memref_slice %arg2[%3, %c0_i32_34] : memref<256x128xf32, #tpu.memory_space<any>> -> memref<1x128xf32, #tpu.memory_space<any>>
    %74 = tpu.memref_squeeze %73 : memref<1x128xf32, #tpu.memory_space<any>> -> memref<128xf32, #tpu.memory_space<any>>
    %c0_i32_35 = arith.constant 0 : i32
    %75 = tpu.memref_slice %arg4[%c0_i32_32, %c0_i32_35] : memref<8x128xf32, #tpu.memory_space<vmem>> -> memref<1x128xf32, #tpu.memory_space<vmem>>
    %76 = tpu.memref_squeeze %75 : memref<1x128xf32, #tpu.memory_space<vmem>> -> memref<128xf32, #tpu.memory_space<vmem>>
    %77 = tpu.memref_slice %arg5[%c0_i32_33] : memref<8x!tpu.dma_semaphore, #tpu.memory_space<semaphore_mem>> -> memref<1x!tpu.dma_semaphore, #tpu.memory_space<semaphore_mem>>
    %78 = tpu.memref_squeeze %77 : memref<1x!tpu.dma_semaphore, #tpu.memory_space<semaphore_mem>> -> memref<!tpu.dma_semaphore, #tpu.memory_space<semaphore_mem>>
    tpu.wait_dma2 semaphore(%78 : memref<!tpu.dma_semaphore, #tpu.memory_space<semaphore_mem>>) src(%74 : memref<128xf32, #tpu.memory_space<any>>) dst(%76 : memref<128xf32, #tpu.memory_space<vmem>>)
    %c1_i32_36 = arith.constant 1 : i32
    %c1_i32_37 = arith.constant 1 : i32
    %c0_i32_38 = arith.constant 0 : i32
    %79 = tpu.memref_slice %arg2[%12, %c0_i32_38] : memref<256x128xf32, #tpu.memory_space<any>> -> memref<1x128xf32, #tpu.memory_space<any>>
    %80 = tpu.memref_squeeze %79 : memref<1x128xf32, #tpu.memory_space<any>> -> memref<128xf32, #tpu.memory_space<any>>
    %c0_i32_39 = arith.constant 0 : i32
    %81 = tpu.memref_slice %arg4[%c1_i32_36, %c0_i32_39] : memref<8x128xf32, #tpu.memory_space<vmem>> -> memref<1x128xf32, #tpu.memory_space<vmem>>
    %82 = tpu.memref_squeeze %81 : memref<1x128xf32, #tpu.memory_space<vmem>> -> memref<128xf32, #tpu.memory_space<vmem>>
    %83 = tpu.memref_slice %arg5[%c1_i32_37] : memref<8x!tpu.dma_semaphore, #tpu.memory_space<semaphore_mem>> -> memref<1x!tpu.dma_semaphore, #tpu.memory_space<semaphore_mem>>
    %84 = tpu.memref_squeeze %83 : memref<1x!tpu.dma_semaphore, #tpu.memory_space<semaphore_mem>> -> memref<!tpu.dma_semaphore, #tpu.memory_space<semaphore_mem>>
    tpu.wait_dma2 semaphore(%84 : memref<!tpu.dma_semaphore, #tpu.memory_space<semaphore_mem>>) src(%80 : memref<128xf32, #tpu.memory_space<any>>) dst(%82 : memref<128xf32, #tpu.memory_space<vmem>>)
    %c2_i32_40 = arith.constant 2 : i32
    %c2_i32_41 = arith.constant 2 : i32
    %c0_i32_42 = arith.constant 0 : i32
    %85 = tpu.memref_slice %arg2[%21, %c0_i32_42] : memref<256x128xf32, #tpu.memory_space<any>> -> memref<1x128xf32, #tpu.memory_space<any>>
    %86 = tpu.memref_squeeze %85 : memref<1x128xf32, #tpu.memory_space<any>> -> memref<128xf32, #tpu.memory_space<any>>
    %c0_i32_43 = arith.constant 0 : i32
    %87 = tpu.memref_slice %arg4[%c2_i32_40, %c0_i32_43] : memref<8x128xf32, #tpu.memory_space<vmem>> -> memref<1x128xf32, #tpu.memory_space<vmem>>
    %88 = tpu.memref_squeeze %87 : memref<1x128xf32, #tpu.memory_space<vmem>> -> memref<128xf32, #tpu.memory_space<vmem>>
    %89 = tpu.memref_slice %arg5[%c2_i32_41] : memref<8x!tpu.dma_semaphore, #tpu.memory_space<semaphore_mem>> -> memref<1x!tpu.dma_semaphore, #tpu.memory_space<semaphore_mem>>
    %90 = tpu.memref_squeeze %89 : memref<1x!tpu.dma_semaphore, #tpu.memory_space<semaphore_mem>> -> memref<!tpu.dma_semaphore, #tpu.memory_space<semaphore_mem>>
    tpu.wait_dma2 semaphore(%90 : memref<!tpu.dma_semaphore, #tpu.memory_space<semaphore_mem>>) src(%86 : memref<128xf32, #tpu.memory_space<any>>) dst(%88 : memref<128xf32, #tpu.memory_space<vmem>>)
    %c3_i32_44 = arith.constant 3 : i32
    %c3_i32_45 = arith.constant 3 : i32
    %c0_i32_46 = arith.constant 0 : i32
    %91 = tpu.memref_slice %arg2[%30, %c0_i32_46] : memref<256x128xf32, #tpu.memory_space<any>> -> memref<1x128xf32, #tpu.memory_space<any>>
    %92 = tpu.memref_squeeze %91 : memref<1x128xf32, #tpu.memory_space<any>> -> memref<128xf32, #tpu.memory_space<any>>
    %c0_i32_47 = arith.constant 0 : i32
    %93 = tpu.memref_slice %arg4[%c3_i32_44, %c0_i32_47] : memref<8x128xf32, #tpu.memory_space<vmem>> -> memref<1x128xf32, #tpu.memory_space<vmem>>
    %94 = tpu.memref_squeeze %93 : memref<1x128xf32, #tpu.memory_space<vmem>> -> memref<128xf32, #tpu.memory_space<vmem>>
    %95 = tpu.memref_slice %arg5[%c3_i32_45] : memref<8x!tpu.dma_semaphore, #tpu.memory_space<semaphore_mem>> -> memref<1x!tpu.dma_semaphore, #tpu.memory_space<semaphore_mem>>
    %96 = tpu.memref_squeeze %95 : memref<1x!tpu.dma_semaphore, #tpu.memory_space<semaphore_mem>> -> memref<!tpu.dma_semaphore, #tpu.memory_space<semaphore_mem>>
    tpu.wait_dma2 semaphore(%96 : memref<!tpu.dma_semaphore, #tpu.memory_space<semaphore_mem>>) src(%92 : memref<128xf32, #tpu.memory_space<any>>) dst(%94 : memref<128xf32, #tpu.memory_space<vmem>>)
    %c4_i32_48 = arith.constant 4 : i32
    %c4_i32_49 = arith.constant 4 : i32
    %c0_i32_50 = arith.constant 0 : i32
    %97 = tpu.memref_slice %arg2[%39, %c0_i32_50] : memref<256x128xf32, #tpu.memory_space<any>> -> memref<1x128xf32, #tpu.memory_space<any>>
    %98 = tpu.memref_squeeze %97 : memref<1x128xf32, #tpu.memory_space<any>> -> memref<128xf32, #tpu.memory_space<any>>
    %c0_i32_51 = arith.constant 0 : i32
    %99 = tpu.memref_slice %arg4[%c4_i32_48, %c0_i32_51] : memref<8x128xf32, #tpu.memory_space<vmem>> -> memref<1x128xf32, #tpu.memory_space<vmem>>
    %100 = tpu.memref_squeeze %99 : memref<1x128xf32, #tpu.memory_space<vmem>> -> memref<128xf32, #tpu.memory_space<vmem>>
    %101 = tpu.memref_slice %arg5[%c4_i32_49] : memref<8x!tpu.dma_semaphore, #tpu.memory_space<semaphore_mem>> -> memref<1x!tpu.dma_semaphore, #tpu.memory_space<semaphore_mem>>
    %102 = tpu.memref_squeeze %101 : memref<1x!tpu.dma_semaphore, #tpu.memory_space<semaphore_mem>> -> memref<!tpu.dma_semaphore, #tpu.memory_space<semaphore_mem>>
    tpu.wait_dma2 semaphore(%102 : memref<!tpu.dma_semaphore, #tpu.memory_space<semaphore_mem>>) src(%98 : memref<128xf32, #tpu.memory_space<any>>) dst(%100 : memref<128xf32, #tpu.memory_space<vmem>>)
    %c5_i32_52 = arith.constant 5 : i32
    %c5_i32_53 = arith.constant 5 : i32
    %c0_i32_54 = arith.constant 0 : i32
    %103 = tpu.memref_slice %arg2[%48, %c0_i32_54] : memref<256x128xf32, #tpu.memory_space<any>> -> memref<1x128xf32, #tpu.memory_space<any>>
    %104 = tpu.memref_squeeze %103 : memref<1x128xf32, #tpu.memory_space<any>> -> memref<128xf32, #tpu.memory_space<any>>
    %c0_i32_55 = arith.constant 0 : i32
    %105 = tpu.memref_slice %arg4[%c5_i32_52, %c0_i32_55] : memref<8x128xf32, #tpu.memory_space<vmem>> -> memref<1x128xf32, #tpu.memory_space<vmem>>
    %106 = tpu.memref_squeeze %105 : memref<1x128xf32, #tpu.memory_space<vmem>> -> memref<128xf32, #tpu.memory_space<vmem>>
    %107 = tpu.memref_slice %arg5[%c5_i32_53] : memref<8x!tpu.dma_semaphore, #tpu.memory_space<semaphore_mem>> -> memref<1x!tpu.dma_semaphore, #tpu.memory_space<semaphore_mem>>
    %108 = tpu.memref_squeeze %107 : memref<1x!tpu.dma_semaphore, #tpu.memory_space<semaphore_mem>> -> memref<!tpu.dma_semaphore, #tpu.memory_space<semaphore_mem>>
    tpu.wait_dma2 semaphore(%108 : memref<!tpu.dma_semaphore, #tpu.memory_space<semaphore_mem>>) src(%104 : memref<128xf32, #tpu.memory_space<any>>) dst(%106 : memref<128xf32, #tpu.memory_space<vmem>>)
    %c6_i32_56 = arith.constant 6 : i32
    %c6_i32_57 = arith.constant 6 : i32
    %c0_i32_58 = arith.constant 0 : i32
    %109 = tpu.memref_slice %arg2[%57, %c0_i32_58] : memref<256x128xf32, #tpu.memory_space<any>> -> memref<1x128xf32, #tpu.memory_space<any>>
    %110 = tpu.memref_squeeze %109 : memref<1x128xf32, #tpu.memory_space<any>> -> memref<128xf32, #tpu.memory_space<any>>
    %c0_i32_59 = arith.constant 0 : i32
    %111 = tpu.memref_slice %arg4[%c6_i32_56, %c0_i32_59] : memref<8x128xf32, #tpu.memory_space<vmem>> -> memref<1x128xf32, #tpu.memory_space<vmem>>
    %112 = tpu.memref_squeeze %111 : memref<1x128xf32, #tpu.memory_space<vmem>> -> memref<128xf32, #tpu.memory_space<vmem>>
    %113 = tpu.memref_slice %arg5[%c6_i32_57] : memref<8x!tpu.dma_semaphore, #tpu.memory_space<semaphore_mem>> -> memref<1x!tpu.dma_semaphore, #tpu.memory_space<semaphore_mem>>
    %114 = tpu.memref_squeeze %113 : memref<1x!tpu.dma_semaphore, #tpu.memory_space<semaphore_mem>> -> memref<!tpu.dma_semaphore, #tpu.memory_space<semaphore_mem>>
    tpu.wait_dma2 semaphore(%114 : memref<!tpu.dma_semaphore, #tpu.memory_space<semaphore_mem>>) src(%110 : memref<128xf32, #tpu.memory_space<any>>) dst(%112 : memref<128xf32, #tpu.memory_space<vmem>>)
    %c7_i32_60 = arith.constant 7 : i32
    %c7_i32_61 = arith.constant 7 : i32
    %c0_i32_62 = arith.constant 0 : i32
    %115 = tpu.memref_slice %arg2[%66, %c0_i32_62] : memref<256x128xf32, #tpu.memory_space<any>> -> memref<1x128xf32, #tpu.memory_space<any>>
    %116 = tpu.memref_squeeze %115 : memref<1x128xf32, #tpu.memory_space<any>> -> memref<128xf32, #tpu.memory_space<any>>
    %c0_i32_63 = arith.constant 0 : i32
    %117 = tpu.memref_slice %arg4[%c7_i32_60, %c0_i32_63] : memref<8x128xf32, #tpu.memory_space<vmem>> -> memref<1x128xf32, #tpu.memory_space<vmem>>
    %118 = tpu.memref_squeeze %117 : memref<1x128xf32, #tpu.memory_space<vmem>> -> memref<128xf32, #tpu.memory_space<vmem>>
    %119 = tpu.memref_slice %arg5[%c7_i32_61] : memref<8x!tpu.dma_semaphore, #tpu.memory_space<semaphore_mem>> -> memref<1x!tpu.dma_semaphore, #tpu.memory_space<semaphore_mem>>
    %120 = tpu.memref_squeeze %119 : memref<1x!tpu.dma_semaphore, #tpu.memory_space<semaphore_mem>> -> memref<!tpu.dma_semaphore, #tpu.memory_space<semaphore_mem>>
    tpu.wait_dma2 semaphore(%120 : memref<!tpu.dma_semaphore, #tpu.memory_space<semaphore_mem>>) src(%116 : memref<128xf32, #tpu.memory_space<any>>) dst(%118 : memref<128xf32, #tpu.memory_space<vmem>>)
    %c0 = arith.constant 0 : index
    %c0_64 = arith.constant 0 : index
    %121 = vector.load %arg4[%c0, %c0_64] : memref<8x128xf32, #tpu.memory_space<vmem>>, vector<8x128xf32>
    %c0_65 = arith.constant 0 : index
    %c0_66 = arith.constant 0 : index
    %122 = vector.load %arg3[%c0_65, %c0_66] : memref<8x128xf32, #tpu.memory_space<vmem>>, vector<8x128xf32>
    tpu.vector_store %arg3[%c0_65, %c0_66], %121 {strides = array<i32>} : memref<8x128xf32, #tpu.memory_space<vmem>>, vector<8x128xf32>,
    return
  }
  func.func @transform_1(%arg0: i32, %arg1: memref<16xi32, #tpu.memory_space<smem>>) -> (i32, i32) {
    %c0_i32 = arith.constant 0 : i32
    %c0_i32_0 = arith.constant 0 : i32
    return %arg0, %c0_i32 : i32, i32
  }
}

module attributes {stable_mosaic.version = 11 : i64} {
  func.func @_pixel_mean_kernel(%arg0: i32, %arg1: i32, %arg2: memref<2x16x128xbf16, #tpu.memory_space<vmem>>, %arg3: memref<2x128xf32, #tpu.memory_space<vmem>>, %arg4: memref<2x128xf32, #tpu.memory_space<vmem>>) attributes {dimension_semantics = [#tpu.dimension_semantics<parallel>, #tpu.dimension_semantics<arbitrary>], iteration_bounds = array<i64: 1, 1>, scalar_prefetch = 0 : i64, scratch_operands = 1 : i64, tpu.core_type = #tpu.core_type<tc>, window_params = [{transform_indices = @transform_0, window_bounds = array<i64: 2, 16, 128>}, {transform_indices = @transform_1, window_bounds = array<i64: 2, 128>}]} {
    %c0_i32 = arith.constant 0 : i32
    %0 = arith.cmpi eq, %arg1, %c0_i32 : i32
    %1 = arith.extui %0 : i1 to i32
    %c0_i32_0 = arith.constant 0 : i32
    %2 = arith.cmpi ne, %1, %c0_i32_0 : i32
    scf.if %2 {
      %cst_9 = arith.constant 0.000000e+00 : f32
      %12 = vector.broadcast %cst_9 : f32 to vector<2x128xf32>
      %c0_10 = arith.constant 0 : index
      %c0_11 = arith.constant 0 : index
      %13 = vector.load %arg4[%c0_10, %c0_11] : memref<2x128xf32, #tpu.memory_space<vmem>>, vector<2x128xf32>
      tpu.vector_store %arg4[%c0_10, %c0_11], %12 {strides = array<i32>} : memref<2x128xf32, #tpu.memory_space<vmem>>, vector<2x128xf32>,
    } else {
    }
    %c0 = arith.constant 0 : index
    %c0_1 = arith.constant 0 : index
    %3 = vector.load %arg4[%c0, %c0_1] : memref<2x128xf32, #tpu.memory_space<vmem>>, vector<2x128xf32>
    %c0_2 = arith.constant 0 : index
    %c0_3 = arith.constant 0 : index
    %c0_4 = arith.constant 0 : index
    %4 = vector.load %arg2[%c0_2, %c0_3, %c0_4] : memref<2x16x128xbf16, #tpu.memory_space<vmem>>, vector<2x16x128xbf16>
    %5 = arith.extf %4 : vector<2x16x128xbf16> to vector<2x16x128xf32>
    %cst = arith.constant dense<0.000000e+00> : vector<2x128xf32>
    %6 = vector.multi_reduction <add>, %5, %cst [1] : vector<2x16x128xf32> to vector<2x128xf32>
    %7 = arith.addf %3, %6 : vector<2x128xf32>
    %c0_5 = arith.constant 0 : index
    %c0_6 = arith.constant 0 : index
    %8 = vector.load %arg4[%c0_5, %c0_6] : memref<2x128xf32, #tpu.memory_space<vmem>>, vector<2x128xf32>
    tpu.vector_store %arg4[%c0_5, %c0_6], %7 {strides = array<i32>} : memref<2x128xf32, #tpu.memory_space<vmem>>, vector<2x128xf32>,
    %c0_i32_7 = arith.constant 0 : i32
    %9 = arith.cmpi eq, %arg1, %c0_i32_7 : i32
    %10 = arith.extui %9 : i1 to i32
    %c0_i32_8 = arith.constant 0 : i32
    %11 = arith.cmpi ne, %10, %c0_i32_8 : i32
    scf.if %11 {
      %c0_9 = arith.constant 0 : index
      %c0_10 = arith.constant 0 : index
      %12 = vector.load %arg4[%c0_9, %c0_10] : memref<2x128xf32, #tpu.memory_space<vmem>>, vector<2x128xf32>
      %cst_11 = arith.constant 6.250000e-02 : f32
      %13 = vector.broadcast %cst_11 : f32 to vector<2x128xf32>
      %14 = arith.mulf %12, %13 : vector<2x128xf32>
      %c0_12 = arith.constant 0 : index
      %c0_13 = arith.constant 0 : index
      %15 = vector.load %arg3[%c0_12, %c0_13] : memref<2x128xf32, #tpu.memory_space<vmem>>, vector<2x128xf32>
      tpu.vector_store %arg3[%c0_12, %c0_13], %14 {strides = array<i32>} : memref<2x128xf32, #tpu.memory_space<vmem>>, vector<2x128xf32>,
    } else {
    }
    return
  }
  func.func @transform_0(%arg0: i32, %arg1: i32) -> (i32, i32, i32) {
    %c0_i32 = arith.constant 0 : i32
    %c0_i32_0 = arith.constant 0 : i32
    return %arg0, %arg1, %c0_i32 : i32, i32, i32
  }
  func.func @transform_1(%arg0: i32, %arg1: i32) -> (i32, i32) {
    %c0_i32 = arith.constant 0 : i32
    %c0_i32_0 = arith.constant 0 : i32
    return %arg0, %c0_i32 : i32, i32
  }
}

</mosaic_0001>

<bundles_post_ra>
// kernel: _device_forward.3
= control target key start
LH: loop header
LB: loop body
LE: loop exit
PB: predicated region body
PF: predicated region fallthrough
CT: control target
= control target key end

     0   :  { %v63_v0 = vmov 0.0   ;;  %vm38_vm0 = vcmask 1041409   ;;  %s83_s0 = inlined_call_operand.vmem [shape: bf16[2,16,128], index: 0, kind: input, shape index: {}]   ;;  %s84_s1 = inlined_call_operand.vmem [shape: f32[2,128], index: 1, kind: output, shape index: {}]  }
   0x1   :  { %12 = vst [vmem:[#allocation2] sm:$0x3] %v63_v0  ;;  %v54_v1 = vld [vmem:[%s83_s0] sm:$0xff]   ;;  %v61_v2 = vld [vmem:[%s83_s0 + $0x8] sm:$0xff]  }
   0x2   :  { %v55_v3 = vunpack.c.l.bf16 %v54_v1  ;;  %v56_v4 = vunpack.c.h.bf16 %v54_v1  ;;  %v59_v5 = vunpack.c.l.bf16 %v61_v2  ;;  %v60_v6 = vunpack.c.h.bf16 %v61_v2 }
   0x4   :  { %v22_v7 = vadd.f32 %v56_v4, %v55_v3  ;;  %v29_v8 = vadd.f32 %v60_v6, %v59_v5 }
   0x6   :  { %v23_v9 = vrot.slane %v22_v7, 4  ;;  %v30_v10 = vrot.slane %v29_v8, 4 }
   0x8   :  { %v24_v11 = vadd.f32 %v23_v9, %v22_v7  ;;  %v31_v12 = vadd.f32 %v30_v10, %v29_v8  ;;  %v13_v19 = vld [vmem:[#allocation2] sm:$0x3] }
   0xa   :  { %v25_v13 = vrot.slane %v24_v11, 2  ;;  %v32_v14 = vrot.slane %v31_v12, 2 }
   0xc   :  { %v26_v15 = vadd.f32 %v25_v13, %v24_v11  ;;  %v33_v16 = vadd.f32 %v32_v14, %v31_v12 }
   0xe   :  { %v27_v17 = vrot.slane %v26_v15, 1  ;;  %v34_v18 = vrot.slane %v33_v16, 1 }
  0x10   :  { %v28_v20 = vadd.f32 %v27_v17, %v26_v15  ;;  %v35_v21 = vadd.f32 %v34_v18, %v33_v16 }
  0x12   :  { %v39_v22 = vsel %vm38_vm0, %v35_v21, %v28_v20 }
  0x13   :  { %v41_v23 = vadd.f32 %v39_v22, %v13_v19 }
  0x15   :  { %42 = vst [vmem:[#allocation2] sm:$0x3] %v41_v23 }
  0x1c   :  { %v46_v24 = vld [vmem:[#allocation2] sm:$0x3] }
  0x1d   :  { %v47_v25 = vmul.f32 0.0625, %v46_v24 }
  0x1f   :  { %48 = vst [vmem:[%s84_s1] sm:$0x3] %v47_v25 }

// kernel: _device_forward.2
= control target key start
LH: loop header
LB: loop body
LE: loop exit
PB: predicated region body
PF: predicated region fallthrough
CT: control target
= control target key end

     0   :  { %s673_s12 = smov [#allocation5]   ;;  %s804_s0 = inlined_call_operand.vmem [shape: s32[16], index: 0, kind: input, shape index: {}]   ;;  %s805_s1 = inlined_call_operand.vmem [shape: f32[256,128], index: 1, kind: input, shape index: {}]   ;;  %s806_s2 = inlined_call_operand.hbm [shape: f32[16,128], index: 2, kind: output, shape index: {}]  }
   0x1   :  { %s8_s11 = sshll.u32 %s804_s0, 4  ;;  %s9_s11 = int_to_ptr.vmem [resolvable:$true] %s8_s11 }
   0x2   :  { %11 = dma.vmem_to_smem %s9_s11, 16, %s673_s12, [#allocation4] }
   0x3   :  { %639 = dma.done.wait [#allocation4], 16 }
   0x4   :  { %640 = vsyncadd [#allocation4], 4294967280 }
   0x5   :  { %14 = sfence }
   0x6   :  { %15 = vsyncpa [#allocation7], 0 }
   0x7   :  { %17 = vsyncpa [#allocation7 + $0x1], 0  ;;  %s692_s13 = smov 0   ;;  %s694_s14 = smov 0  }
   0x8   :  { %s696_s15 = smov 0  }
   0x9 LB: > { %s538_s0 = sadd.s32 4294967295, %s671_s15   ;;  %s709_s16 = sadd.s32 1, %s671_s15   ;;  %s671_s15 = sphi %s696_s15, %s811_s15   ;;  %s667_s14 = sphi %s694_s14, %s810_s14   ;;  %s663_s13 = sphi %s692_s13, %s809_s13  }
   0xa   : > { %s26_s17 = ssub.s32 %s671_s15, %s709_s16  ;;  %s29_s18 = sadd.s32 1, %s667_s14 }
   0xb   : > { %p27_p0 = scmp.eq.s32.totalorder %s26_s17, 0  ;;  %p539_p1 = scmp.ne.s32.totalorder %s26_s17, 0 }
   0xc   : > { %p33_p2 = scmp.eq.s32.totalorder %s671_s15, 1  ;;  %p38_p3 = scmp.ne.s32.totalorder %s667_s14, %s663_s13 }
   0xd   : > { %s718_s19 = scalar_select %p27_p0, %s667_s14, %s29_s18  }
   0xe   : > { %p720_p4 = por %p539_p1, %p33_p2  ;;  %p39_p5 = scmp.eq.s32.totalorder %s538_s0, 1 }
   0xf   : > { %p540_p7 = scmp.ge.s32.totalorder %s671_s15, 2 }
  0x10   : > { %p724_p6 = por %p39_p5, %p38_p3  ;;  %s53_s22 = sand.u32 (!%p540_p7), 1, %s667_s14  }
  0x11   : > { %48 = sbr.rel (%p540_p7) target bundleno = 127 (0x7f), region = 12  ;;  %s731_s23 = sshll.u32 (!%p540_p7), %s671_s15, 3 }
  0x12   : > { %s735_s24 = sshll.u32 (!%p540_p7), %s53_s22, 3  ;;  %s57_s25 = sld [smem:[#allocation5 + %s731_s23]] (!%p540_p7) }
  0x13   : > { %s55_s29 = scalar_lea.vmem (!%p540_p7), [#allocation6], %s735_s24 }
  0x18   : > { %s58_s28 = scalar_lea.vmem %s805_s1, %s57_s25 }
  0x19   : > { %v73_v0 = vld [vmem:[%s58_s28] sm:$0x1] }
  0x1a   : > { %74 = vst [vmem:[#allocation2] sm:$0x1] %v73_v0 }
  0x1b   : > { %92 = vsyncadd [#allocation3], 16  ;;  %s93_s30 = sadd.s32 1, %s731_s23 }
  0x1c   : > { %s94_s3 = sld [smem:[#allocation5 + %s93_s30]] }
  0x22   : > { %s95_s6 = scalar_lea.vmem %s805_s1, %s94_s3 }
  0x23   : > { %v112_v1 = vld [vmem:[%s95_s6] sm:$0x1] }
  0x24   : > { %113 = vst [vmem:[#allocation2 + $0x1] sm:$0x1] %v112_v1 }
  0x25   : > { %131 = vsyncadd [#allocation3 + $0x1], 16  ;;  %s132_s7 = sadd.s32 2, %s731_s23 }
  0x26   : > { %s133_s8 = sld [smem:[#allocation5 + %s132_s7]] }
  0x2c   : > { %s134_s11 = scalar_lea.vmem %s805_s1, %s133_s8 }
  0x2d   : > { %v151_v2 = vld [vmem:[%s134_s11] sm:$0x1] }
  0x2e   : > { %152 = vst [vmem:[#allocation2 + $0x2] sm:$0x1] %v151_v2 }
  0x2f   : > { %170 = vsyncadd [#allocation3 + $0x2], 16  ;;  %s171_s12 = sadd.s32 3, %s731_s23 }
  0x30   : > { %s172_s0 = sld [smem:[#allocation5 + %s171_s12]] }
  0x36   : > { %s173_s25 = scalar_lea.vmem %s805_s1, %s172_s0 }
  0x37   : > { %v190_v3 = vld [vmem:[%s173_s25] sm:$0x1] }
  0x38   : > { %191 = vst [vmem:[#allocation2 + $0x3] sm:$0x1] %v190_v3 }
  0x39   : > { %209 = vsyncadd [#allocation3 + $0x3], 16  ;;  %s210_s26 = sadd.s32 4, %s731_s23 }
  0x3a   : > { %s211_s27 = sld [smem:[#allocation5 + %s210_s26]] }
  0x40   : > { %s212_s3 = scalar_lea.vmem %s805_s1, %s211_s27 }
  0x41   : > { %v229_v4 = vld [vmem:[%s212_s3] sm:$0x1] }
  0x42   : > { %230 = vst [vmem:[#allocation2 + $0x4] sm:$0x1] %v229_v4 }
  0x43   : > { %248 = vsyncadd [#allocation3 + $0x4], 16  ;;  %s249_s4 = sadd.s32 5, %s731_s23 }
  0x44   : > { %s250_s5 = sld [smem:[#allocation5 + %s249_s4]] }
  0x4a   : > { %s251_s8 = scalar_lea.vmem %s805_s1, %s250_s5 }
  0x4b   : > { %v268_v5 = vld [vmem:[%s251_s8] sm:$0x1] }
  0x4c   : > { %269 = vst [vmem:[#allocation2 + $0x5] sm:$0x1] %v268_v5 }
  0x4d   : > { %287 = vsyncadd [#allocation3 + $0x5], 16  ;;  %s288_s9 = sadd.s32 6, %s731_s23 }
  0x4e   : > { %s289_s10 = sld [smem:[#allocation5 + %s288_s9]] }
  0x54   : > { %s290_s0 = scalar_lea.vmem %s805_s1, %s289_s10 }
  0x55   : > { %v307_v6 = vld [vmem:[%s290_s0] sm:$0x1] }
  0x56   : > { %308 = vst [vmem:[#allocation2 + $0x6] sm:$0x1] %v307_v6 }
  0x57   : > { %326 = vsyncadd [#allocation3 + $0x6], 16  ;;  %s327_s17 = sadd.s32 7, %s731_s23 }
  0x58   : > { %s328_s18 = sld [smem:[#allocation5 + %s327_s17]] }
  0x5e   : > { %s329_s27 = scalar_lea.vmem %s805_s1, %s328_s18 }
  0x5f   : > { %v346_v7 = vld [vmem:[%s329_s27] sm:$0x1] }
  0x60   : > { %347 = vst [vmem:[#allocation2 + $0x7] sm:$0x1] %v346_v7 }
  0x61   : > { %365 = vsyncadd [#allocation3 + $0x7], 16 }
  0x62   : > { %641 = dma.done.wait [#allocation3], 16 }
  0x63   : > { %642 = vsyncadd [#allocation3], 4294967280 }
  0x64   : > { %643 = dma.done.wait [#allocation3 + $0x1], 16 }
  0x65   : > { %644 = vsyncadd [#allocation3 + $0x1], 4294967280 }
  0x66   : > { %645 = dma.done.wait [#allocation3 + $0x2], 16 }
  0x67   : > { %646 = vsyncadd [#allocation3 + $0x2], 4294967280 }
  0x68   : > { %647 = dma.done.wait [#allocation3 + $0x3], 16 }
  0x69   : > { %648 = vsyncadd [#allocation3 + $0x3], 4294967280 }
  0x6a   : > { %649 = dma.done.wait [#allocation3 + $0x4], 16 }
  0x6b   : > { %650 = vsyncadd [#allocation3 + $0x4], 4294967280 }
  0x6c   : > { %651 = dma.done.wait [#allocation3 + $0x5], 16 }
  0x6d   : > { %652 = vsyncadd [#allocation3 + $0x5], 4294967280 }
  0x6e   : > { %653 = dma.done.wait [#allocation3 + $0x6], 16 }
  0x6f   : > { %654 = vsyncadd [#allocation3 + $0x6], 4294967280 }
  0x70   : > { %655 = dma.done.wait [#allocation3 + $0x7], 16 }
  0x71   : > { %656 = vsyncadd [#allocation3 + $0x7], 4294967280  ;;  %s395_s3 = scalar_lea.hbm %s806_s2, %s731_s23  ;;  %s397_s4 = sshll.u32 %s55_s29, 4  ;;  %v382_v8 = vld [vmem:[#allocation2] sm:$0xff]  ;;  %s398_s4 = int_to_ptr.vmem [resolvable:$true] %s397_s4 }
  0x72   : > { %s399_s5 = sshll.u32 %s395_s3, 4  ;;  %383 = vst [vmem:[%s55_s29] sm:$0xff] %v382_v8  ;;  %s385_s6 = scalar_lea.sflag [#allocation7], %s53_s22  ;;  %s400_s5 = int_to_ptr.hbm [resolvable:$true] %s399_s5 }
  0x73   : > { %s613_s7 = sshra.s32 %s400_s5, 4  ;;  %s619_s23 = scalar_lea.hbm %s806_s2, 16  ;;  %s614_s7 = int_to_ptr.hbm [resolvable:$true] %s613_s7 }
  0x74   : > { %s615_s8 = scalar_lea.hbm %s614_s7, 8  ;;  %p620_p11 = scmp.lt.s32.totalorder %s614_s7, %s806_s2 }
  0x75   : > { %p616_p8 = scmp.ne.s32.totalorder %s614_s7, %s615_s8  ;;  %p621_p12 = scmp.lt.s32.totalorder %s619_s23, %s615_s8 }
  0x77   : > { %p617_p9 = pnand %p616_p8, %p720_p4  ;;  %p622_p13 = por %p621_p12, %p620_p11 }
  0x79   : > { %p618_p10 = pneg %p617_p9 }
  0x7b   : > { %p623_p0 = pnand %p622_p13, %p618_p10 }
  0x7d   : > { %626 = shalt.err (!%p623_p0)
}
  0x7e   : > { %555 = dma.vmem_to_hbm [thread:$0]  (%p720_p4), %s398_s4, 128, %s400_s5, %s385_s6  }
  0x7f PF: > { %p561_p1 = scmp.ge.s32.totalorder %s671_s15, 1  ;;  %s411_s22 = sand.u32 1, %s663_s13  }
  0x80   : > { %s412_s24 = scalar_lea.sflag [#allocation7], %s411_s22 }
  0x81   : > { %p558_p2 = pnand %p561_p1, %p724_p6 }
  0x83   : > { %p559_p3 = pneg %p558_p2 }
  0x85   : > { %658 = dma.done.wait (%p559_p3), %s412_s24, 128  }
  0x86   : > { %660 = vsyncadd (%p559_p3), %s412_s24, 4294967168  ;;  %p20_p5 = scmp.ge.s32.totalorder %s709_s16, 3   ;;  %s809_s13 = smov %s667_s14 }
  0x87   : > { %s810_s14 = smov %s718_s19  ;;  %s811_s15 = smov %s709_s16 }
  0x88   :  { %22 = sbr.rel (!%p20_p5) target bundleno = 9 (0x9), region = 345 }
  0x8d   :  { %418 = vsyncpa [#allocation7], 1 }
  0x8e   :  { %420 = vsyncpa [#allocation7 + $0x1], 1 }
  0x8f   :  { %421 = vsyncmov [#allocation3] }
  0x92   :  { %s422_s15 = vpop.sfrf %421 }
  0x93   :  { %p547_p4 = scmp.ne.s32.totalorder %s422_s15, 0 }
  0x95   :  { %426 = shalt.err (%p547_p4)  }
  0x96   :  { %428 = vsyncmov [#allocation3 + $0x1] }
  0x99   :  { %s429_s20 = vpop.sfrf %428 }
  0x9a   :  { %p548_p6 = scmp.ne.s32.totalorder %s429_s20, 0 }
  0x9c   :  { %433 = shalt.err (%p548_p6)  }
  0x9d   :  { %435 = vsyncmov [#allocation3 + $0x2] }
  0xa0   :  { %s436_s21 = vpop.sfrf %435 }
  0xa1   :  { %p549_p7 = scmp.ne.s32.totalorder %s436_s21, 0 }
  0xa3   :  { %440 = shalt.err (%p549_p7)  }
  0xa4   :  { %442 = vsyncmov [#allocation3 + $0x3] }
  0xa7   :  { %s443_s29 = vpop.sfrf %442 }
  0xa8   :  { %p550_p8 = scmp.ne.s32.totalorder %s443_s29, 0 }
  0xaa   :  { %447 = shalt.err (%p550_p8)  }
  0xab   :  { %449 = vsyncmov [#allocation3 + $0x4] }
  0xae   :  { %s450_s16 = vpop.sfrf %449 }
  0xaf   :  { %p551_p9 = scmp.ne.s32.totalorder %s450_s16, 0 }
  0xb1   :  { %454 = shalt.err (%p551_p9)  }
  0xb2   :  { %456 = vsyncmov [#allocation3 + $0x5] }
  0xb5   :  { %s457_s1 = vpop.sfrf %456 }
  0xb6   :  { %p552_p10 = scmp.ne.s32.totalorder %s457_s1, 0 }
  0xb8   :  { %461 = shalt.err (%p552_p10)  }
  0xb9   :  { %463 = vsyncmov [#allocation3 + $0x6] }
  0xbc   :  { %s464_s2 = vpop.sfrf %463 }
  0xbd   :  { %p553_p11 = scmp.ne.s32.totalorder %s464_s2, 0 }
  0xbf   :  { %468 = shalt.err (%p553_p11)  }
  0xc0   :  { %470 = vsyncmov [#allocation3 + $0x7] }
  0xc3   :  { %s471_s13 = vpop.sfrf %470 }
  0xc4   :  { %p554_p12 = scmp.ne.s32.totalorder %s471_s13, 0 }
  0xc6   :  { %475 = shalt.err (%p554_p12)  }

</bundles_post_ra>
